<compile_context>
chip_gen: v7x
topology: tpu7x:2x2x1
jax: 0.10.0
libtpu: 0.0.40
codegen_flags: <defaults>
</compile_context>

<pallas_src>
import jax
import jax.numpy as jnp
from jax import lax
from jax.experimental import pallas as pl
from jax.experimental.pallas import tpu as pltpu


def _round_up(x, m):
    return (x + m - 1) // m * m


def _vmem_params():
    """Generation-aware (tile budget, scoped vmem limit, minimum tile count)."""
    cap = 64 * 1024 * 1024
    try:
        info = pltpu.get_tpu_info()
        cap = getattr(info, "vmem_capacity_bytes", cap) or cap
    except Exception:
        pass
    if cap >= 100 * 1024 * 1024:
        # v5e / v6e: 128 MiB physical VMEM and slower HBM -> the biggest tile
        # that fits amortizes the ~0.35us per-grid-step overhead best.
        return 28 * 1024 * 1024, 64 * 1024 * 1024, 1
    # v7x: 64 MiB per TensorCore, 2 TCs sharding the grid -> keep the per-core
    # double-buffered working set conservative but ensure >= 4 tiles so the
    # megacore split has work for both cores.
    return 14 * 1024 * 1024, 32 * 1024 * 1024, 4


def _tile_bytes(batch, tn, k, elem_bytes):
    # 2 h-streams x 2 pipeline buffers x (B, TN, K) + 2 outputs x 2 buffers.
    return 4 * batch * tn * k * elem_bytes + 4 * batch * tn * 4


def _choose_node_tile(n, batch, k, elem_bytes, budget, min_tiles):
    fits = lambda t: _tile_bytes(batch, t, k, elem_bytes) <= budget
    eff_min = min(min_tiles, max(1, n // 128))
    # Single tile over all nodes: no node padding, single grid step.
    if eff_min <= 1 and fits(n):
        return n
    cands = [t for t in (4096, 2048, 1024, 512, 256, 128) if fits(t)]
    if not cands:
        cands = [128]
    # Prefer a tile that divides N exactly (skips the jnp.pad HBM copy).
    for t in cands:
        if n % t == 0 and pl.cdiv(n, t) >= eff_min:
            return t
    for t in cands:
        if pl.cdiv(n, t) >= eff_min:
            return t
    return cands[-1]


# ---------------------------------------------------------------------------
# Streaming kernel: per-node bilinear scores against the precomputed u.
#   sc1[b, n] = <h_pl[b, n, :], u[b, :]> + bias
#   sc2[b, n] = <h_mi[b, n, :], u[b, :]> + bias
# ---------------------------------------------------------------------------
def _score_kernel(u_ref, hpl_ref, hmi_ref, b_ref, sc1_ref, sc2_ref):
    bias = b_ref[0]                                     # scalar from SMEM
    # (B,1,K) x (B,TN,K) contracted over K -> (B,1,TN): the batched-matmul
    # 'bqd,bkd->bqk' pattern (MXU / vex slot), lane-dense in TN.  u is cast to
    # the streamed dtype so a bf16 stream takes the native bf16 MXU path;
    # accumulation is f32 either way via preferred_element_type.
    u = u_ref[...].astype(hpl_ref.dtype)[:, None, :]    # (B, 1, K), VMEM-resident
    dn = (((2,), (2,)), ((0,), (0,)))                   # contract K, batch over B
    sc1 = lax.dot_general(u, hpl_ref[...], dn,
                          preferred_element_type=jnp.float32)   # (B, 1, TN)
    sc2 = lax.dot_general(u, hmi_ref[...], dn,
                          preferred_element_type=jnp.float32)   # (B, 1, TN)
    sc1_ref[...] = sc1[:, 0, :] + bias                  # (B, TN)
    sc2_ref[...] = sc2[:, 0, :] + bias                  # (B, TN)


def discriminator_forward(c, h_pl, h_mi, weight, bias,
                          s_bias1=None, s_bias2=None, stream_dtype=None):
    """DGI Discriminator forward.

    c:      (B, n_h)
    h_pl:   (B, N, n_h)
    h_mi:   (B, N, n_h)
    weight: (n_h, n_h)   -- PyTorch Bilinear weight (1, n_h, n_h), squeezed
    bias:   scalar       -- PyTorch Bilinear bias (1,)
    returns logits: (B, 2N)
    """
    B, N, n_h = h_pl.shape
    assert c.shape == (B, n_h)
    assert h_mi.shape == (B, N, n_h)
    assert weight.shape == (n_h, n_h)

    # Streamed dtype for the two big tensors (the only bandwidth-relevant
    # arrays).  Default preserves the caller's dtype (exact f32 parity for
    # f32 inputs); pass stream_dtype=jnp.bfloat16 to halve streamed HBM bytes.
    if stream_dtype is None:
        stream_dtype = (h_pl.dtype if h_pl.dtype in (jnp.bfloat16, jnp.float32)
                        else jnp.float32)
    h_pl_s = h_pl.astype(stream_dtype)
    h_mi_s = h_mi.astype(stream_dtype)
    elem_bytes = jnp.dtype(stream_dtype).itemsize

    # u[b, :] = c[b, :] @ W^T  -- tiny (B x n_h x n_h): plain XLA, hoisted out
    # of the streaming loop (no extra kernel launch, no padding of c / W).
    u = jnp.einsum("bj,ij->bi", c.astype(jnp.float32),
                   weight.astype(jnp.float32))
    bias_arr = jnp.asarray(bias, jnp.float32).reshape(1)

    budget, vmem_limit, min_tiles = _vmem_params()
    tn = _choose_node_tile(N, B, n_h, elem_bytes, budget, min_tiles)
    n_pad = _round_up(N, tn)

    # Only the node axis is ever padded, and only when N is not tile-aligned.
    # Padded node rows just produce `bias` values that are sliced off below;
    # K is never padded on the big tensors (block last dim == full array dim).
    if n_pad != N:
        h_pl_s = jnp.pad(h_pl_s, ((0, 0), (0, n_pad - N), (0, 0)))
        h_mi_s = jnp.pad(h_mi_s, ((0, 0), (0, n_pad - N), (0, 0)))

    grid = (n_pad // tn,)
    sc1, sc2 = pl.pallas_call(
        _score_kernel,
        out_shape=(jax.ShapeDtypeStruct((B, n_pad), jnp.float32),
                   jax.ShapeDtypeStruct((B, n_pad), jnp.float32)),
        grid_spec=pltpu.PrefetchScalarGridSpec(
            num_scalar_prefetch=0,
            grid=grid,
            in_specs=[
                pl.BlockSpec((B, n_h), lambda n: (0, 0)),         # u (resident)
                pl.BlockSpec((B, tn, n_h), lambda n: (0, n, 0)),  # h_pl tile
                pl.BlockSpec((B, tn, n_h), lambda n: (0, n, 0)),  # h_mi tile
                pl.BlockSpec(memory_space=pltpu.SMEM),            # bias scalar
            ],
            out_specs=[
                pl.BlockSpec((B, tn), lambda n: (0, n)),          # sc1 tile
                pl.BlockSpec((B, tn), lambda n: (0, n)),          # sc2 tile
            ],
        ),
        compiler_params=pltpu.CompilerParams(
            dimension_semantics=("parallel",),
            vmem_limit_bytes=vmem_limit),
    )(u, h_pl_s, h_mi_s, bias_arr)

    sc1 = sc1[:, :N]
    sc2 = sc2[:, :N]
    if s_bias1 is not None:
        sc1 = sc1 + s_bias1
    if s_bias2 is not None:
        sc2 = sc2 + s_bias2
    # Concatenation stays outside the kernel (no in-kernel copy needed).
    return jnp.concatenate([sc1, sc2], axis=1)


def _init_bilinear_params(key, n_h):
    # torch.nn.init.xavier_uniform_ on weight of shape (1, n_h, n_h):
    # fan_in = n_h * n_h, fan_out = 1 * n_h -> bound = sqrt(6/(fan_in+fan_out))
    fan_in = n_h * n_h
    fan_out = n_h
    bound = (6.0 / (fan_in + fan_out)) ** 0.5
    w = jax.random.uniform(key, (n_h, n_h), jnp.float32, -bound, bound)
    b = jnp.zeros((), jnp.float32)  # bias.fill_(0.0)
    return w, b


def _reference_forward(c, h_pl, h_mi, weight, bias):
    # Plain-JAX reference of the bilinear discriminator.
    u = jnp.einsum("bj,ij->bi", c, weight)                    # (B, n_h)
    sc1 = jnp.einsum("bni,bi->bn", h_pl, u) + bias            # (B, N)
    sc2 = jnp.einsum("bni,bi->bn", h_mi, u) + bias            # (B, N)
    return jnp.concatenate([sc1, sc2], axis=1)                # (B, 2N)


if __name__ == "__main__":
    B, N, n_h = 2, 8, 32

    key = jax.random.PRNGKey(0)
    k_c, k_pl, k_mi, k_w = jax.random.split(key, 4)

    c = jax.random.normal(k_c, (B, n_h), jnp.float32)
    h_pl = jax.random.normal(k_pl, (B, N, n_h), jnp.float32)
    h_mi = jax.random.normal(k_mi, (B, N, n_h), jnp.float32)
    weight, bias = _init_bilinear_params(k_w, n_h)

    logits = discriminator_forward(c, h_pl, h_mi, weight, bias)
    jax.block_until_ready(logits)

    ref = _reference_forward(c, h_pl, h_mi, weight, bias)
    assert logits.shape == (B, 2 * N)
    assert jnp.allclose(logits, ref, atol=1e-4, rtol=1e-4)

    print("KERNEL_OK")
</pallas_src>

<mosaic_0001>
module attributes {stable_mosaic.version = 11 : i64} {
  func.func @_score_kernel(%arg0: i32, %arg1: memref<2x32xf32, #tpu.memory_space<vmem>>, %arg2: memref<2x8x32xf32, #tpu.memory_space<vmem>>, %arg3: memref<2x8x32xf32, #tpu.memory_space<vmem>>, %arg4: memref<1xf32, #tpu.memory_space<smem>>, %arg5: memref<2x8xf32, #tpu.memory_space<vmem>>, %arg6: memref<2x8xf32, #tpu.memory_space<vmem>>) attributes {dimension_semantics = [#tpu.dimension_semantics<parallel>], iteration_bounds = array<i64: 1>, scalar_prefetch = 0 : i64, scratch_operands = 0 : i64, tpu.core_type = #tpu.core_type<tc>, window_params = [{pipeline_mode = #tpu.pipeline_mode<synchronous>, transform_indices = @transform_0, window_bounds = array<i64: 2, 32>}, {transform_indices = @transform_1, window_bounds = array<i64: 2, 8, 32>}, {transform_indices = @transform_2, window_bounds = array<i64: 2, 8, 32>}, {transform_indices = @transform_3, window_bounds = array<i64: 1>}, {transform_indices = @transform_4, window_bounds = array<i64: 2, 8>}, {transform_indices = @transform_5, window_bounds = array<i64: 2, 8>}]} {
    %c0 = arith.constant 0 : index
    %0 = memref.load %arg4[%c0] : memref<1xf32, #tpu.memory_space<smem>>
    %c0_0 = arith.constant 0 : index
    %c0_1 = arith.constant 0 : index
    %1 = vector.load %arg1[%c0_0, %c0_1] : memref<2x32xf32, #tpu.memory_space<vmem>>, vector<2x32xf32>
    %2 = vector.shape_cast %1 : vector<2x32xf32> to vector<2x1x32xf32>
    %c0_2 = arith.constant 0 : index
    %c0_3 = arith.constant 0 : index
    %c0_4 = arith.constant 0 : index
    %3 = vector.load %arg2[%c0_2, %c0_3, %c0_4] : memref<2x8x32xf32, #tpu.memory_space<vmem>>, vector<2x8x32xf32>
    %cst = arith.constant dense<0.000000e+00> : vector<2x1x8xf32>
    %4 = tpu.matmul %2, %3, %cst {dimension_numbers = #tpu.dot_dimension_numbers<[2], [2], [1], [1], [0, 0, 0, 1, 1, 1], [0], [0]>} : vector<2x1x32xf32>, vector<2x8x32xf32>, vector<2x1x8xf32> -> vector<2x1x8xf32>
    %c0_5 = arith.constant 0 : index
    %c0_6 = arith.constant 0 : index
    %c0_7 = arith.constant 0 : index
    %5 = vector.load %arg3[%c0_5, %c0_6, %c0_7] : memref<2x8x32xf32, #tpu.memory_space<vmem>>, vector<2x8x32xf32>
    %cst_8 = arith.constant dense<0.000000e+00> : vector<2x1x8xf32>
    %6 = tpu.matmul %2, %5, %cst_8 {dimension_numbers = #tpu.dot_dimension_numbers<[2], [2], [1], [1], [0, 0, 0, 1, 1, 1], [0], [0]>} : vector<2x1x32xf32>, vector<2x8x32xf32>, vector<2x1x8xf32> -> vector<2x1x8xf32>
    %7 = vector.shape_cast %4 : vector<2x1x8xf32> to vector<2x8xf32>
    %8 = vector.broadcast %0 : f32 to vector<2x8xf32>
    %9 = arith.addf %7, %8 : vector<2x8xf32>
    %c0_9 = arith.constant 0 : index
    %c0_10 = arith.constant 0 : index
    %10 = vector.load %arg5[%c0_9, %c0_10] : memref<2x8xf32, #tpu.memory_space<vmem>>, vector<2x8xf32>
    tpu.vector_store %arg5[%c0_9, %c0_10], %9 {strides = array<i32>} : memref<2x8xf32, #tpu.memory_space<vmem>>, vector<2x8xf32>,
    %11 = vector.shape_cast %6 : vector<2x1x8xf32> to vector<2x8xf32>
    %12 = vector.broadcast %0 : f32 to vector<2x8xf32>
    %13 = arith.addf %11, %12 : vector<2x8xf32>
    %c0_11 = arith.constant 0 : index
    %c0_12 = arith.constant 0 : index
    %14 = vector.load %arg6[%c0_11, %c0_12] : memref<2x8xf32, #tpu.memory_space<vmem>>, vector<2x8xf32>
    tpu.vector_store %arg6[%c0_11, %c0_12], %13 {strides = array<i32>} : memref<2x8xf32, #tpu.memory_space<vmem>>, vector<2x8xf32>,
    return
  }
  func.func @transform_0(%arg0: i32) -> (i32, i32) {
    %c0_i32 = arith.constant 0 : i32
    %c0_i32_0 = arith.constant 0 : i32
    %c0_i32_1 = arith.constant 0 : i32
    return %c0_i32, %c0_i32_0 : i32, i32
  }
  func.func @transform_1(%arg0: i32) -> (i32, i32, i32) {
    %c0_i32 = arith.constant 0 : i32
    %c0_i32_0 = arith.constant 0 : i32
    %c0_i32_1 = arith.constant 0 : i32
    return %c0_i32, %arg0, %c0_i32_0 : i32, i32, i32
  }
  func.func @transform_2(%arg0: i32) -> (i32, i32, i32) {
    %c0_i32 = arith.constant 0 : i32
    %c0_i32_0 = arith.constant 0 : i32
    %c0_i32_1 = arith.constant 0 : i32
    return %c0_i32, %arg0, %c0_i32_0 : i32, i32, i32
  }
  func.func @transform_3(%arg0: i32) -> i32 {
    %c0_i32 = arith.constant 0 : i32
    %c0_i32_0 = arith.constant 0 : i32
    return %c0_i32 : i32
  }
  func.func @transform_4(%arg0: i32) -> (i32, i32) {
    %c0_i32 = arith.constant 0 : i32
    %c0_i32_0 = arith.constant 0 : i32
    return %c0_i32, %arg0 : i32, i32
  }
  func.func @transform_5(%arg0: i32) -> (i32, i32) {
    %c0_i32 = arith.constant 0 : i32
    %c0_i32_0 = arith.constant 0 : i32
    return %c0_i32, %arg0 : i32, i32
  }
}

</mosaic_0001>

<bundles_post_ra>
// kernel: tpu_custom_call.1
= control target key start
LH: loop header
LB: loop body
LE: loop exit
PB: predicated region body
PF: predicated region fallthrough
CT: control target
= control target key end

     0   :  { %12 = vsyncpa [#allocation4], 0  ;;  %s676_s0 = inlined_call_operand.vmem [shape: f32[2,32], index: 0, kind: input, shape index: {}]   ;;  %s677_s1 = inlined_call_operand.hbm [shape: f32[2,8,32], index: 1, kind: input, shape index: {}]   ;;  %s678_s2 = inlined_call_operand.hbm [shape: f32[2,8,32], index: 2, kind: input, shape index: {}]   ;;  %s679_s3 = inlined_call_operand.<no memory space> [shape: f32[1], index: 3, kind: input, shape index: {}]   ;;  %s680_s4 = inlined_call_operand.hbm [shape: f32[2,8], index: 4, kind: output, shape index: {0}]   ;;  %s681_s5 = inlined_call_operand.hbm [shape: f32[2,8], index: 5, kind: output, shape index: {1}]  }
   0x1   :  { %13 = vsyncpa [#allocation7], 0 }
   0x2   :  { %14 = vsyncpa [#allocation5], 0 }
   0x3   :  { %15 = vsyncpa [#allocation10], 0  ;;  %s567_s18 = smov [#allocation3]   ;;  %s471_s22 = scalar_lea.hbm %s677_s1, 256 }
   0x4   :  { %s23_s19 = sshll.u32 %s567_s18, 4  ;;  %p472_p0 = scmp.ne.s32.totalorder %s677_s1, %s471_s22  ;;  %s24_s19 = int_to_ptr.vmem [resolvable:$true] %s23_s19 }
   0x5   :  { %p475_p1 = scmp.lt.u32.totalorder %s471_s22, %s677_s1 }
   0x7   :  { %p477_p2 = pnand %p475_p1, %p472_p0 }
   0x9   :  { %480 = shalt.err (!%p477_p2)
}
   0xa   :  { %s481_s27 = scalar_lea.vmem %s24_s19, 256  ;;  %p486_p4 = scmp.lt.s32.totalorder %s24_s19, %s24_s19 }
   0xb   :  { %p482_p3 = scmp.ne.s32.totalorder %s24_s19, %s481_s27  ;;  %p487_p5 = scmp.lt.s32.totalorder %s481_s27, %s481_s27 }
   0xd   :  { %p488_p6 = por %p487_p5, %p486_p4 }
   0xf   :  { %p489_p7 = pnand %p488_p6, %p482_p3 }
  0x11   :  { %492 = shalt.err (!%p489_p7)
}
  0x12   :  { %s568_s28 = smov 128   ;;  %s569_s29 = smov 8  }
  0x13   :  { %29 = dma.hbm_to_vmem [thread:$0]  %s677_s1, 256, %s24_s19, [#allocation4], %s568_s28, %s568_s28, %s569_s29  }
  0x14   :  { %s570_s7 = smov [#allocation6]   ;;  %s493_s11 = scalar_lea.hbm %s678_s2, 256 }
  0x15   :  { %s35_s8 = sshll.u32 %s570_s7, 4  ;;  %p494_p8 = scmp.ne.s32.totalorder %s678_s2, %s493_s11  ;;  %s36_s8 = int_to_ptr.vmem [resolvable:$true] %s35_s8 }
  0x16   :  { %p497_p9 = scmp.lt.u32.totalorder %s493_s11, %s678_s2 }
  0x18   :  { %p499_p10 = pnand %p497_p9, %p494_p8 }
  0x1a   :  { %502 = shalt.err (!%p499_p10)
}
  0x1b   :  { %s503_s16 = scalar_lea.vmem %s36_s8, 256  ;;  %p508_p12 = scmp.lt.s32.totalorder %s36_s8, %s36_s8 }
  0x1c   :  { %p504_p11 = scmp.ne.s32.totalorder %s36_s8, %s503_s16  ;;  %p509_p13 = scmp.lt.s32.totalorder %s503_s16, %s503_s16 }
  0x1e   :  { %p510_p0 = por %p509_p13, %p508_p12 }
  0x20   :  { %p511_p1 = pnand %p510_p0, %p504_p11 }
  0x22   :  { %514 = shalt.err (!%p511_p1)
}
  0x23   :  { %41 = dma.hbm_to_vmem [thread:$0]  %s678_s2, 256, %s36_s8, [#allocation7], %s568_s28, %s568_s28, %s569_s29  }
  0x24   :  { %559 = dma.done.wait [#allocation4], 256  }
  0x25   :  { %560 = vsyncadd [#allocation4], 4294967040 }
  0x26   :  { %561 = dma.done.wait [#allocation7], 256  }
  0x27   :  { %562 = vsyncadd [#allocation7], 4294967040  ;;  %v64_v0 = vlaneseq  ;;  %v571_v1 = vmov 0.0   ;;  %vm572_vm0 = vmmov 0   ;;  %v573_v2 = vmov 1966171168  }
  0x28   :  { %447 = vmatprep.subr.mxu1 %v571_v1  ;;  %442 = vmatprep.subr.mxu0 %v571_v1  ;;  %v62_v3 = vunpack.c.l.s4 %v573_v2  ;;  %vm77_vm1 = vcmask 261120   ;;  %v76_v7 = vld [vmem:[#allocation3 + $0x8] sm:$0xff]  ;;  %v75_v8 = vld [vmem:[#allocation3] sm:$0xff]  ;;  %v228_v12 = vld [vmem:[#allocation6] sm:$0xff]  ;;  %v376_v15 = vstv %s679_s3  ;;  %s574_s20 = smov [#allocation8]   ;;  %vm382_vm2 = vcmask 1041409  }
  0x29   :  { %449 = vmatprep.mubr.msk.f32.mxu1 %vm572_vm0, %v571_v1  ;;  %444 = vmatprep.mubr.msk.f32.mxu0 %vm572_vm0, %v571_v1  ;;  %v65_v4 = vshrl.u32 %v64_v0, 7  ;;  %v425_v9 = vld.sshfl [vmem:[%s676_s0] sm:$0x11 pattern:$0x75316420]  ;;  %v229_v14 = vld [vmem:[#allocation6 + $0x8] sm:$0xff] }
  0x2a   :  { %v63_v5 = vunpack.c.0.s8 %v62_v3  ;;  %448 = vmatpush3.xpose.msk.msra.mxu1 %vm77_vm1, %v76_v7  ;;  %443 = vmatpush3.xpose.msk.msra.mxu0 %vm77_vm1, %v75_v8  ;;  %v60_v10 = vcombine.high %v425_v9, %v425_v9  ;;  %s401_s21 = sshll.u32 %s574_s20, 4  ;;  %vm385_vm3 = vcmask 58368   ;;  %s575_s3 = smov [#allocation9]   ;;  %s402_s21 = int_to_ptr.vmem [resolvable:$true] %s401_s21 }
  0x2b   :  { %457 = vmatprep.subr.mxu1 %v571_v1  ;;  %452 = vmatprep.subr.mxu0 %v571_v1  ;;  %s411_s22 = sshll.u32 %s575_s3, 4  ;;  %s515_s23 = scalar_lea.vmem %s402_s21, 32  ;;  %s412_s22 = int_to_ptr.vmem [resolvable:$true] %s411_s22 }
  0x2c   :  { %v66_v6 = vsub.s32 %v63_v5, %v65_v4  ;;  %p516_p2 = scmp.ne.s32.totalorder %s402_s21, %s515_s23  ;;  %p520_p3 = scmp.lt.s32.totalorder %s402_s21, %s402_s21 }
  0x2d   :  { %p521_p4 = scmp.lt.s32.totalorder %s515_s23, %s515_s23 }
  0x2e   :  { %v67_v11 = vrot.slane %v425_v9, %v66_v6  ;;  %v74_v13 = vrot.slane %v60_v10, %v66_v6 }
  0x2f   :  { %p522_p5 = por %p521_p4, %p520_p3 }
  0x30   :  { %445 = vmatmul.mubr.msk.f32.vlgmr.msra.gmra.mrb[0].mxu0 %vm77_vm1, %v67_v11  ;;  %450 = vmatmul.mubr.msk.f32.vlgmr.msra.gmra.mrb[0].mxu1 %vm77_vm1, %v74_v13 }
  0x31   :  { %453 = vmatpush3.xpose.msk.msra.mxu0 %vm77_vm1, %v228_v12  ;;  %458 = vmatpush3.xpose.msk.msra.mxu1 %vm77_vm1, %v229_v14  ;;  %p523_p6 = pnand %p522_p5, %p516_p2 }
  0x32   :  { %459 = vmatprep.mubr.msk.f32.mxu1 %vm572_vm0, %v571_v1  ;;  %454 = vmatprep.mubr.msk.f32.mxu0 %vm572_vm0, %v571_v1 }
  0x34   :  { %455 = vmatmul.mubr.msk.f32.vlgmr.msra.gmra.mrb[2].mxu0 %vm77_vm1, %v67_v11  ;;  %460 = vmatmul.mubr.msk.f32.vlgmr.msra.gmra.mrb[2].mxu1 %vm77_vm1, %v74_v13 }
 0x103   :  { %v149_v16 = vpop.f32.mrb[0].mxu0  ;;  %v224_v17 = vpop.f32.mrb[0].mxu1 }
 0x104   :  { %v446_v18 = vpop.f32.mrb[1].mxu0  ;;  %v378_v19 = vadd.f32 %v376_v15, %v224_v17  ;;  %v377_v20 = vadd.f32 %v376_v15, %v149_v16  ;;  %v451_v21 = vpop.f32.mrb[1].mxu1 }
 0x106   :  { %v381_v22 = vrot.slane %v378_v19, 7 }
 0x107   :  { %v299_v23 = vpop.f32.mrb[2].mxu0  ;;  %v372_v24 = vpop.f32.mrb[2].mxu1 }
 0x108   :  { %v456_v25 = vpop.f32.mrb[3].mxu0  ;;  %v388_v26 = vadd.f32 %v376_v15, %v372_v24  ;;  %v387_v27 = vadd.f32 %v376_v15, %v299_v23  ;;  %v461_v28 = vpop.f32.mrb[3].mxu1  ;;  %v383_v29 = vsel %vm382_vm2, %v381_v22, %v377_v20 }
 0x109   :  { %386 = vst.msk [vmem:[#allocation8] sm:$0x3] %vm385_vm3, %v383_v29 }
 0x10a   :  { %v391_v30 = vrot.slane %v388_v26, 7 }
 0x10b   :  { %526 = shalt.err (!%p523_p6)
}
 0x10c   :  { %s527_s26 = scalar_lea.hbm %s680_s4, 32 }
 0x10d   :  { %p528_p7 = scmp.ne.s32.totalorder %s680_s4, %s527_s26  ;;  %p531_p8 = scmp.lt.u32.totalorder %s527_s26, %s680_s4 }
 0x10f   :  { %p533_p9 = pnand %p531_p8, %p528_p7 }
 0x111   :  { %536 = shalt.err (!%p533_p9)
}
 0x112   :  { %404 = dma.vmem_to_hbm [thread:$0]  %s402_s21, 32, %s680_s4, [#allocation5]   ;;  %v392_v31 = vsel %vm382_vm2, %v391_v30, %v387_v27 }
 0x113   :  { %394 = vst.msk [vmem:[#allocation9] sm:$0x3] %vm385_vm3, %v392_v31  ;;  %s537_s8 = scalar_lea.vmem %s412_s22, 32  ;;  %p542_p11 = scmp.lt.s32.totalorder %s412_s22, %s412_s22 }
 0x114   :  { %p538_p10 = scmp.ne.s32.totalorder %s412_s22, %s537_s8  ;;  %p543_p12 = scmp.lt.s32.totalorder %s537_s8, %s537_s8 }
 0x116   :  { %p544_p13 = por %p543_p12, %p542_p11 }
 0x118   :  { %p545_p0 = pnand %p544_p13, %p538_p10 }
 0x11a   :  { %548 = shalt.err (!%p545_p0)
}
 0x11b   :  { %s549_s11 = scalar_lea.hbm %s681_s5, 32 }
 0x11c   :  { %p550_p1 = scmp.ne.s32.totalorder %s681_s5, %s549_s11  ;;  %p553_p2 = scmp.lt.u32.totalorder %s549_s11, %s681_s5 }
 0x11e   :  { %p555_p3 = pnand %p553_p2, %p550_p1 }
 0x120   :  { %558 = shalt.err (!%p555_p3)
}
 0x121   :  { %414 = dma.vmem_to_hbm [thread:$0]  %s412_s22, 32, %s681_s5, [#allocation10]  }
 0x122   :  { %563 = dma.done.wait [#allocation5], 32  }
 0x123   :  { %564 = vsyncadd [#allocation5], 4294967264 }
 0x124   :  { %565 = dma.done.wait [#allocation10], 32  }
 0x125   :  { %566 = vsyncadd [#allocation10], 4294967264 }
 0x126   :  { %421 = vsyncpa [#allocation4], 1 }
 0x127   :  { %422 = vsyncpa [#allocation7], 1 }
 0x128   :  { %423 = vsyncpa [#allocation5], 1 }
 0x129   :  { %424 = vsyncpa [#allocation10], 1 }

</bundles_post_ra>
